<compile_context>
chip_gen: v7x
topology: tpu7x:2x2x1
jax: 0.10.0
libtpu: 0.0.40
codegen_flags: <defaults>
</compile_context>

<pallas_src>
import jax
import jax.numpy as jnp
from jax.experimental import pallas as pl
from jax.experimental.pallas import tpu as pltpu


def _spectral_calib_kernel(x_ref, w_ref, bias_ref, o_ref):
    # x_ref:    (1, C_in, TILE_S)  NCHW-native tile (spatial on the lane axis)
    # w_ref:    (C_out, C_in)      BN-scale-folded 1x1 conv weight
    # bias_ref: (C_out, 1)         folded BN bias (includes conv bias)
    # o_ref:    (1, C_out, TILE_S)
    y = jnp.dot(w_ref[...], x_ref[0], preferred_element_type=jnp.float32)
    y = y + bias_ref[...]
    o_ref[0] = jnp.maximum(y, 0.0).astype(o_ref.dtype)


def _pick_tile_s(sp, max_tile=8192):
    """Largest multiple of 128 that divides sp (sp is a multiple of 128), capped."""
    best = 128
    t = 128
    while t <= min(sp, max_tile):
        if sp % t == 0:
            best = t
        t += 128
    return best


@jax.jit
def spectral_calibration(x_nchw, conv_w, conv_b, gamma, beta,
                         running_mean, running_var, eps=1e-5):
    """x_nchw: (N, C_in, H, W) float32.  conv_w: (C_out, C_in, 1, 1)."""
    N, C_in, H, W = x_nchw.shape
    C_out = conv_w.shape[0]
    S = H * W

    # Fold eval-mode BN into the conv: scale goes into the weight, bias stays.
    inv_std = jax.lax.rsqrt(running_var + eps)
    scale = gamma * inv_std                                   # (C_out,)
    bias = (conv_b - running_mean) * scale + beta             # (C_out,)
    w_folded = conv_w.reshape(C_out, C_in) * scale[:, None]   # (C_out, C_in)
    bias2 = bias.reshape(C_out, 1)

    # NCHW-native view: flatten spatial onto the lane axis (reshape, no transpose).
    x = x_nchw.reshape(N, C_in, S)

    # Pad spatial to a multiple of 128 only if required (no-op for 16x16).
    Sp = ((S + 127) // 128) * 128
    if Sp != S:
        x = jnp.pad(x, ((0, 0), (0, 0), (0, Sp - S)))
    tile_s = _pick_tile_s(Sp)

    grid = (N, Sp // tile_s)
    out = pl.pallas_call(
        _spectral_calib_kernel,
        out_shape=jax.ShapeDtypeStruct((N, C_out, Sp), x_nchw.dtype),
        grid_spec=pltpu.PrefetchScalarGridSpec(
            num_scalar_prefetch=0,
            grid=grid,
            in_specs=[
                pl.BlockSpec((1, C_in, tile_s), lambda n, s: (n, 0, s)),
                pl.BlockSpec((C_out, C_in), lambda n, s: (0, 0)),
                pl.BlockSpec((C_out, 1), lambda n, s: (0, 0)),
            ],
            out_specs=pl.BlockSpec((1, C_out, tile_s), lambda n, s: (n, 0, s)),
        ),
        compiler_params=pltpu.CompilerParams(
            dimension_semantics=("parallel", "parallel")),
    )(x, w_folded, bias2)

    if Sp != S:
        out = out[:, :, :S]
    return out.reshape(N, C_out, H, W)


def _reference(x_nchw, conv_w, conv_b, gamma, beta, running_mean, running_var,
               eps=1e-5):
    # Pure-JAX reference of Conv2d(1x1) -> BN(eval) -> ReLU, NCHW.
    y = jax.lax.conv_general_dilated(
        x_nchw, conv_w, window_strides=(1, 1), padding="VALID",
        dimension_numbers=("NCHW", "OIHW", "NCHW"))
    y = y + conv_b.reshape(1, -1, 1, 1)
    inv_std = jax.lax.rsqrt(running_var + eps)
    y = (y - running_mean.reshape(1, -1, 1, 1)) * (gamma * inv_std).reshape(1, -1, 1, 1) \
        + beta.reshape(1, -1, 1, 1)
    return jnp.maximum(y, 0.0)


if __name__ == "__main__":
    key = jax.random.PRNGKey(0)
    k_x, k_w, k_b, k_g, k_be, k_m, k_v = jax.random.split(key, 7)

    N, C_in, H, W = 2, 4, 16, 16
    C_out = 32

    x = jax.random.normal(k_x, (N, C_in, H, W), dtype=jnp.float32)
    conv_w = jax.random.normal(k_w, (C_out, C_in, 1, 1), dtype=jnp.float32) * 0.1
    conv_b = jax.random.normal(k_b, (C_out,), dtype=jnp.float32) * 0.1
    gamma = 1.0 + 0.1 * jax.random.normal(k_g, (C_out,), dtype=jnp.float32)
    beta = 0.1 * jax.random.normal(k_be, (C_out,), dtype=jnp.float32)
    running_mean = 0.1 * jax.random.normal(k_m, (C_out,), dtype=jnp.float32)
    running_var = 1.0 + 0.1 * jax.random.uniform(k_v, (C_out,), dtype=jnp.float32)

    out = spectral_calibration(x, conv_w, conv_b, gamma, beta,
                               running_mean, running_var)
    out = jax.block_until_ready(out)

    ref = _reference(x, conv_w, conv_b, gamma, beta, running_mean, running_var)
    assert out.shape == (N, C_out, H, W)
    assert jnp.allclose(out, ref, atol=1e-5, rtol=1e-5), "mismatch vs reference"

    print("KERNEL_OK")
</pallas_src>

<mosaic_0001>
module attributes {stable_mosaic.version = 11 : i64} {
  func.func @_spectral_calib_kernel(%arg0: i32, %arg1: i32, %arg2: memref<1x4x256xf32, #tpu.memory_space<vmem>>, %arg3: memref<32x4xf32, #tpu.memory_space<vmem>>, %arg4: memref<32x1xf32, #tpu.memory_space<vmem>>, %arg5: memref<1x32x256xf32, #tpu.memory_space<vmem>>) attributes {dimension_semantics = [#tpu.dimension_semantics<parallel>, #tpu.dimension_semantics<parallel>], iteration_bounds = array<i64: 2, 1>, scalar_prefetch = 0 : i64, scratch_operands = 0 : i64, tpu.core_type = #tpu.core_type<tc>, window_params = [{transform_indices = @transform_0, window_bounds = array<i64: 1, 4, 256>}, {pipeline_mode = #tpu.pipeline_mode<synchronous>, transform_indices = @transform_1, window_bounds = array<i64: 32, 4>}, {pipeline_mode = #tpu.pipeline_mode<synchronous>, transform_indices = @transform_2, window_bounds = array<i64: 32, 1>}, {transform_indices = @transform_3, window_bounds = array<i64: 1, 32, 256>}]} {
    %c0 = arith.constant 0 : index
    %c0_0 = arith.constant 0 : index
    %0 = vector.load %arg3[%c0, %c0_0] : memref<32x4xf32, #tpu.memory_space<vmem>>, vector<32x4xf32>
    %c0_1 = arith.constant 0 : index
    %c0_2 = arith.constant 0 : index
    %c0_3 = arith.constant 0 : index
    %1 = vector.load %arg2[%c0_1, %c0_2, %c0_3] : memref<1x4x256xf32, #tpu.memory_space<vmem>>, vector<1x4x256xf32>
    %2 = vector.shape_cast %1 : vector<1x4x256xf32> to vector<4x256xf32>
    %cst = arith.constant dense<0.000000e+00> : vector<32x256xf32>
    %3 = tpu.matmul %0, %2, %cst {dimension_numbers = #tpu.dot_dimension_numbers<[1], [0], [0], [1], [0, 0, 1, 1], [], []>} : vector<32x4xf32>, vector<4x256xf32>, vector<32x256xf32> -> vector<32x256xf32>
    %c0_4 = arith.constant 0 : index
    %c0_5 = arith.constant 0 : index
    %4 = vector.load %arg4[%c0_4, %c0_5] : memref<32x1xf32, #tpu.memory_space<vmem>>, vector<32x1xf32>
    %5 = vector.broadcast %4 : vector<32x1xf32> to vector<32x256xf32>
    %6 = arith.addf %3, %5 : vector<32x256xf32>
    %cst_6 = arith.constant 0.000000e+00 : f32
    %7 = vector.broadcast %cst_6 : f32 to vector<32x256xf32>
    %8 = arith.maximumf %6, %7 : vector<32x256xf32>
    %c0_7 = arith.constant 0 : index
    %c0_8 = arith.constant 0 : index
    %c0_9 = arith.constant 0 : index
    %9 = vector.load %arg5[%c0_7, %c0_8, %c0_9] : memref<1x32x256xf32, #tpu.memory_space<vmem>>, vector<1x32x256xf32>
    %10 = vector.shape_cast %9 : vector<1x32x256xf32> to vector<32x256xf32>
    %11 = vector.shape_cast %8 : vector<32x256xf32> to vector<1x32x256xf32>
    tpu.vector_store %arg5[%c0_7, %c0_8, %c0_9], %11 {strides = array<i32>} : memref<1x32x256xf32, #tpu.memory_space<vmem>>, vector<1x32x256xf32>,
    return
  }
  func.func @transform_0(%arg0: i32, %arg1: i32) -> (i32, i32, i32) {
    %c0_i32 = arith.constant 0 : i32
    %c0_i32_0 = arith.constant 0 : i32
    return %arg0, %c0_i32, %arg1 : i32, i32, i32
  }
  func.func @transform_1(%arg0: i32, %arg1: i32) -> (i32, i32) {
    %c0_i32 = arith.constant 0 : i32
    %c0_i32_0 = arith.constant 0 : i32
    %c0_i32_1 = arith.constant 0 : i32
    return %c0_i32, %c0_i32_0 : i32, i32
  }
  func.func @transform_2(%arg0: i32, %arg1: i32) -> (i32, i32) {
    %c0_i32 = arith.constant 0 : i32
    %c0_i32_0 = arith.constant 0 : i32
    %c0_i32_1 = arith.constant 0 : i32
    return %c0_i32, %c0_i32_0 : i32, i32
  }
  func.func @transform_3(%arg0: i32, %arg1: i32) -> (i32, i32, i32) {
    %c0_i32 = arith.constant 0 : i32
    %c0_i32_0 = arith.constant 0 : i32
    return %arg0, %c0_i32, %arg1 : i32, i32, i32
  }
}

</mosaic_0001>

<bundles_post_ra>
// kernel: spectral_calibration.1
= control target key start
LH: loop header
LB: loop body
LE: loop exit
PB: predicated region body
PF: predicated region fallthrough
CT: control target
= control target key end

     0   :  { %s547_s12 = smov 0   ;;  %s549_s13 = smov 0   ;;  %s608_s0 = inlined_call_operand.vmem [shape: f32[2,4,256], index: 0, kind: input, shape index: {}]   ;;  %s609_s1 = inlined_call_operand.vmem [shape: f32[32,4], index: 1, kind: input, shape index: {}]   ;;  %s610_s2 = inlined_call_operand.vmem [shape: f32[32,1], index: 2, kind: input, shape index: {}]   ;;  %s611_s3 = inlined_call_operand.vmem [shape: f32[2,32,256], index: 3, kind: output, shape index: {}]  }
   0x1   :  { %s551_s14 = smov 0  }
   0x2 LB: > { %s25_s15 = sadd.s32 1, %s519_s13  ;;  %p455_p0 = scmp.ge.s32.totalorder %s523_s14, 1  ;;  %s523_s14 = sphi %s551_s14, %s13_s14   ;;  %s519_s13 = sphi %s549_s13, %s613_s13   ;;  %s515_s12 = sphi %s547_s12, %s612_s12  }
   0x3   : > { %p27_p1 = scmp.ge.s32.totalorder %s25_s15, 2  ;;  %p158_p2 = scmp.lt.s32.totalorder %s523_s14, 3 }
   0x5   : > { %s615_s15 = smov (%p27_p1, %s25_s15), 0  ;;  %p159_p3 = pnand %p455_p0, %p158_p2 }
   0x6   : > { %p191_p4 = scmp.lt.s32.totalorder (!%p159_p3), %s515_s12, 1  ;;  %v525_v0 = vmov (!%p159_p3), 0.0   ;;  %v217_v1 = vld [vmem:[%s610_s2 + $0x10] sm:$0xff] (!%p159_p3)  ;;  %v526_v2 = vmov (!%p159_p3), 0   ;;  %v215_v3 = vld [vmem:[%s610_s2] sm:$0xff] (!%p159_p3)  ;;  %v218_v4 = vld [vmem:[%s610_s2 + $0x18] sm:$0xff] (!%p159_p3) }
   0x7   : > { %162 = sbr.rel (%p159_p3) target bundleno = 244 (0xf4), region = 32  ;;  %323 = vmatprep.mubr.f32.mxu0 (!%p159_p3), %v525_v0  ;;  %335 = vmatprep.mubr.f32.mxu1 (!%p159_p3), %v525_v0  ;;  %v216_v5 = vld [vmem:[%s610_s2 + $0x8] sm:$0xff] (!%p159_p3)  ;;  %vm254_vm0 = vcmask (!%p159_p3), 1043456   ;;  %v210_v8 = vld [vmem:[%s609_s1] sm:$0xff] (!%p159_p3)  ;;  %vm241_vm1 = vcmask (!%p159_p3), 31744   ;;  %v212_v9 = vld [vmem:[%s609_s1 + $0x10] sm:$0xff] (!%p159_p3) }
   0x8   : > { %499 = vset.pattern.permute.xlu1 (!%p159_p3), %v526_v2  ;;  %498 = vset.pattern.permute.xlu0 (!%p159_p3), %v526_v2  ;;  %v211_v10 = vld [vmem:[%s609_s1 + $0x8] sm:$0xff] (!%p159_p3)  ;;  %v213_v11 = vld [vmem:[%s609_s1 + $0x18] sm:$0xff] (!%p159_p3) }
   0x9   : > { %231 = vperm.xlu1 (!%p159_p3), %499, %v217_v1   ;;  %221 = vperm.xlu0 (!%p159_p3), %498, %v215_v3  }
   0xd   : > { %236 = vperm.xlu1 (!%p159_p3), %499, %v218_v4   ;;  %226 = vperm.xlu0 (!%p159_p3), %498, %v216_v5  }
   0xe   : > { %s617_s12 = smov (!%p191_p4, %s515_s12), 1 }
   0xf   : > { %s468_s20 = sshll.u32 %s617_s12, 3  ;;  %s469_s9 = sshll.u32 %s617_s12, 6 }
  0x10   : > { %s198_s27 = scalar_lea.vmem %s608_s0, %s468_s20  ;;  %s208_s16 = scalar_lea.vmem %s611_s3, %s469_s9 }
  0x11   : > { %v214_v6 = vld [vmem:[%s198_s27] sm:$0xff] }
  0x12   : > { %v240_v7 = vcombine.high %v214_v6, %v214_v6 }
  0x14   : > { %460 = vmatprep.subr.msk.mxu0 %vm254_vm0, %v240_v7  ;;  %470 = vmatprep.subr.msk.mxu1 %vm254_vm0, %v240_v7 }
  0x15   : > { %461 = vmatpush1.msk.msra.mxu0 %vm254_vm0, %v214_v6  ;;  %471 = vmatpush1.msk.msra.mxu1 %vm254_vm0, %v214_v6 }
  0x16   : > { %462 = vmatmul.mubr.msk.f32.vlgmr.msra.gmra.mrb[0].mxu0 %vm241_vm1, %v210_v8  ;;  %464 = vmatmul.mubr.msk.f32.vlgmr.msra.gmra.mrb[0].mxu1 %vm241_vm1, %v212_v9 }
  0x17   : > { %329 = vmatprep.mubr.f32.mxu0 %v525_v0  ;;  %341 = vmatprep.mubr.f32.mxu1 %v525_v0 }
  0x1a   : > { %463 = vmatmul.mubr.msk.f32.gmra.mrb[2].mxu0 %vm241_vm1, %v211_v10  ;;  %465 = vmatmul.mubr.msk.f32.gmra.mrb[2].mxu1 %vm241_vm1, %v213_v11 }
  0x88   : > { %v232_v12 = vpop.permute.xlu1 %231  ;;  %v222_v13 = vpop.permute.xlu0 %221 }
  0x8c   : > { %v237_v24 = vpop.permute.xlu1 %236  ;;  %v227_v25 = vpop.permute.xlu0 %226 }
  0xe9   : > { %v325_v14 = vpop.f32.mrb[0].mxu0  ;;  %v337_v15 = vpop.f32.mrb[0].mxu1 }
  0xea   : > { %v326_v16 = vadd.f32 %v325_v14, %v222_v13  ;;  %v338_v17 = vadd.f32 %v337_v15, %v232_v12  ;;  %v327_v18 = vpop.f32.mrb[1].mxu0  ;;  %v339_v19 = vpop.f32.mrb[1].mxu1 }
  0xeb   : > { %v328_v20 = vadd.f32 %v327_v18, %v222_v13  ;;  %v340_v21 = vadd.f32 %v339_v19, %v232_v12 }
  0xec   : > { %v348_v22 = vmax.f32 %v326_v16, 0.0  ;;  %v352_v23 = vmax.f32 %v338_v17, 0.0 }
  0xed   : > { %v349_v26 = vmax.f32 %v328_v20, 0.0  ;;  %v353_v27 = vmax.f32 %v340_v21, 0.0  ;;  %v331_v28 = vpop.f32.mrb[2].mxu0  ;;  %v343_v29 = vpop.f32.mrb[2].mxu1 }
  0xee   : > { %356 = vst [vmem:[%s208_s16] sm:$0xff] %v348_v22  ;;  %360 = vst [vmem:[%s208_s16 + $0x20] sm:$0xff] %v352_v23  ;;  %v332_v30 = vadd.f32 %v331_v28, %v227_v25  ;;  %v344_v31 = vadd.f32 %v343_v29, %v237_v24  ;;  %v333_v32 = vpop.f32.mrb[3].mxu0  ;;  %v345_v33 = vpop.f32.mrb[3].mxu1 }
  0xef   : > { %357 = vst [vmem:[%s208_s16 + $0x8] sm:$0xff] %v349_v26  ;;  %361 = vst [vmem:[%s208_s16 + $0x28] sm:$0xff] %v353_v27  ;;  %v334_v34 = vadd.f32 %v333_v32, %v227_v25  ;;  %v346_v35 = vadd.f32 %v345_v33, %v237_v24 }
  0xf0   : > { %v350_v36 = vmax.f32 %v332_v30, 0.0  ;;  %v354_v37 = vmax.f32 %v344_v31, 0.0 }
  0xf1   : > { %v351_v38 = vmax.f32 %v334_v34, 0.0  ;;  %v355_v39 = vmax.f32 %v346_v35, 0.0 }
  0xf2   : > { %358 = vst [vmem:[%s208_s16 + $0x10] sm:$0xff] %v350_v36  ;;  %362 = vst [vmem:[%s208_s16 + $0x30] sm:$0xff] %v354_v37 }
  0xf3   : > { %359 = vst [vmem:[%s208_s16 + $0x18] sm:$0xff] %v351_v38  ;;  %363 = vst [vmem:[%s208_s16 + $0x38] sm:$0xff] %v355_v39 }
  0xf4 PF: > { %s13_s14 = sadd.s32 1, %s523_s14   ;;  %s612_s12 = smov %s519_s13 }
  0xf5   : > { %p10_p5 = scmp.ge.s32.totalorder %s13_s14, 4   ;;  %s613_s13 = smov %s615_s15 }
  0xf7   :  { %12 = sbr.rel (!%p10_p5) target bundleno = 2 (0x2), region = 62 }

</bundles_post_ra>
